<compile_context>
chip_gen: v6e
topology: v6e:2x2x1
jax: 0.10.0
libtpu: 0.0.40
codegen_flags: <defaults>
</compile_context>

<pallas_src>
import jax
import jax.numpy as jnp
from jax import lax
from jax.experimental import pallas as pl
from jax.experimental.pallas import tpu as pltpu

IN_DIM, HID_DIM, OUT_DIM = 2, 50, 2
LANE = 128


def _round_up(n, m):
    return ((n + m - 1) // m) * m


def _pick_tile(batch, tile_b):
    """Lane-aligned batch tile; keep >=2 tiles when batch is large (v7x)."""
    tile_b = max(LANE, _round_up(tile_b, LANE))          # force multiple of 128
    tb = min(tile_b, _round_up(batch, LANE))
    # v7x has 2 TensorCores; "parallel" only helps with >=2 grid tiles.
    if batch > 2 * LANE and pl.cdiv(batch, tb) < 2:
        tb = _round_up(pl.cdiv(batch, 2), LANE)
    return tb


# ---------------------------------------------------------------------------
# In-kernel f(x) = W2 @ tanh(W1 @ x + b1) + b2   with x feature-major (2, TB)
# ---------------------------------------------------------------------------
def _f(x, w1, b1, w2, b2, layer1_on_mxu):
    if layer1_on_mxu:
        # Large batch: MXU has enormous slack (layer-2 uses <2% of it), so the
        # K=2 "waste" is irrelevant and this frees the 4-wide VALU slot.
        h = jnp.dot(w1, x, preferred_element_type=jnp.float32) + b1
    else:
        # Small batch: depth-2 contraction as two VPU broadcast MACs.
        h = w1[:, 0:1] * x[0:1, :] + w1[:, 1:2] * x[1:2, :] + b1
    h = jnp.tanh(h)                                       # EUP
    # Layer 2: (2,50) @ (50,TB) on the MXU, f32 accumulation.
    return jnp.dot(w2, h, preferred_element_type=jnp.float32) + b2


def _make_forward_kernel(layer1_on_mxu):
    def kernel(x_ref, w1_ref, b1_ref, w2_ref, b2_ref, o_ref):
        x = x_ref[...].astype(jnp.float32)
        y = _f(x, w1_ref[...], b1_ref[...], w2_ref[...], b2_ref[...],
               layer1_on_mxu)
        o_ref[...] = y.astype(o_ref.dtype)
    return kernel


def _make_rk4_kernel(n_steps, dt, layer1_on_mxu):
    dt = float(dt)

    def kernel(x_ref, w1_ref, b1_ref, w2_ref, b2_ref, o_ref):
        w1 = w1_ref[...]
        b1 = b1_ref[...]
        w2 = w2_ref[...]
        b2 = b2_ref[...]

        def f(x):
            return _f(x, w1, b1, w2, b2, layer1_on_mxu)

        def step(_, x):
            k1 = f(x)
            k2 = f(x + (0.5 * dt) * k1)
            k3 = f(x + (0.5 * dt) * k2)
            k4 = f(x + dt * k3)
            return x + (dt / 6.0) * (k1 + 2.0 * k2 + 2.0 * k3 + k4)

        x = x_ref[...].astype(jnp.float32)
        x = lax.fori_loop(0, n_steps, step, x, unroll=(n_steps <= 8))
        o_ref[...] = x.astype(o_ref.dtype)

    return kernel


# ---------------------------------------------------------------------------
# Wrappers
# ---------------------------------------------------------------------------
def prepare_params(w1, b1, w2, b2):
    """Once-per-solve constant prep (hoisted out of the per-step hot path)."""
    return (w1.astype(jnp.float32),
            b1.reshape(HID_DIM, 1).astype(jnp.float32),
            w2.astype(jnp.float32),
            b2.reshape(OUT_DIM, 1).astype(jnp.float32))


def _specs(tb):
    in_specs = [
        pl.BlockSpec((IN_DIM, tb), lambda i: (0, i)),        # x tile (streamed)
        pl.BlockSpec((HID_DIM, IN_DIM), lambda i: (0, 0)),   # W1 (VMEM-resident)
        pl.BlockSpec((HID_DIM, 1), lambda i: (0, 0)),        # b1
        pl.BlockSpec((OUT_DIM, HID_DIM), lambda i: (0, 0)),  # W2
        pl.BlockSpec((OUT_DIM, 1), lambda i: (0, 0)),        # b2
    ]
    out_spec = pl.BlockSpec((OUT_DIM, tb), lambda i: (0, i))
    return in_specs, out_spec


def odefunc_forward_fm(t, x_t, params, *, tile_b=2048, layer1_on_mxu=None):
    """Feature-major forward: x_t (2, B) -> (2, B).  No wrapper-side XLA ops."""
    del t  # unused, matching the PyTorch module
    w1, b1c, w2, b2c = params
    batch = x_t.shape[1]
    tb = _pick_tile(batch, tile_b)
    n_tiles = pl.cdiv(batch, tb)
    if layer1_on_mxu is None:
        layer1_on_mxu = tb >= 1024

    return pl.pallas_call(
        _make_forward_kernel(layer1_on_mxu),
        out_shape=jax.ShapeDtypeStruct((OUT_DIM, batch), x_t.dtype),
        grid=(n_tiles,),
        in_specs=_specs(tb)[0],
        out_specs=_specs(tb)[1],
        compiler_params=pltpu.CompilerParams(
            dimension_semantics=("parallel",)),      # v7x: 2 TCs split tiles
    )(x_t, w1, b1c, w2, b2c)


def odefunc_forward(t, x, w1, b1, w2, b2, *, tile_b=2048, layer1_on_mxu=None):
    """Batch-major convenience wrapper: x (B, 2) -> (B, 2) (PyTorch layout).

    For a solver loop, prefer odefunc_forward_fm / odefunc_rk4_solve_fm with
    prepare_params() called once, so the transposes/casts happen only once.
    """
    params = prepare_params(w1, b1, w2, b2)
    out_t = odefunc_forward_fm(t, x.T, params, tile_b=tile_b,
                               layer1_on_mxu=layer1_on_mxu)
    return out_t.T


def odefunc_rk4_solve_fm(x0_t, params, *, dt, n_steps, tile_b=2048,
                         layer1_on_mxu=None):
    """Fused RK4 integrator: n_steps * 4 f() evaluations in ONE pallas_call.

    x0_t is feature-major (2, B); returns the state after n_steps steps.
    Weights stay VMEM-resident; the state never round-trips to HBM between
    evaluations, amortizing all dispatch / DMA / grid-step overhead.
    """
    w1, b1c, w2, b2c = params
    batch = x0_t.shape[1]
    tb = _pick_tile(batch, tile_b)
    n_tiles = pl.cdiv(batch, tb)
    if layer1_on_mxu is None:
        layer1_on_mxu = tb >= 1024

    return pl.pallas_call(
        _make_rk4_kernel(int(n_steps), float(dt), layer1_on_mxu),
        out_shape=jax.ShapeDtypeStruct((OUT_DIM, batch), x0_t.dtype),
        grid=(n_tiles,),
        in_specs=_specs(tb)[0],
        out_specs=_specs(tb)[1],
        compiler_params=pltpu.CompilerParams(
            dimension_semantics=("parallel",)),
    )(x0_t, w1, b1c, w2, b2c)


# ---------------------------------------------------------------------------
# Self-test
# ---------------------------------------------------------------------------
if __name__ == "__main__":
    key = jax.random.PRNGKey(0)
    kx, k1, k2, k3, k4 = jax.random.split(key, 5)

    # PyTorch nn.Linear default init: U(-1/sqrt(fan_in), +1/sqrt(fan_in)),
    # weights stored (out_features, in_features).
    bound1 = 1.0 / (IN_DIM ** 0.5)
    bound2 = 1.0 / (HID_DIM ** 0.5)
    w1 = jax.random.uniform(k1, (HID_DIM, IN_DIM), jnp.float32, -bound1, bound1)
    b1 = jax.random.uniform(k2, (HID_DIM,), jnp.float32, -bound1, bound1)
    w2 = jax.random.uniform(k3, (OUT_DIM, HID_DIM), jnp.float32, -bound2, bound2)
    b2 = jax.random.uniform(k4, (OUT_DIM,), jnp.float32, -bound2, bound2)

    def ref_f(x):   # PyTorch semantics: tanh(x @ W1.T + b1) @ W2.T + b2
        return jnp.tanh(x @ w1.T + b1) @ w2.T + b2

    t = jnp.float32(0.0)  # unused, as in the PyTorch module
    params = prepare_params(w1, b1, w2, b2)

    # 1) Small batch, batch-major API (VPU layer-1 path, single tile).
    x_small = jax.random.normal(kx, (8, IN_DIM), jnp.float32)
    out = jax.block_until_ready(odefunc_forward(t, x_small, w1, b1, w2, b2))
    assert out.shape == (8, OUT_DIM)
    assert jnp.allclose(out, ref_f(x_small), atol=1e-5, rtol=1e-5), (
        f"fwd small max err {jnp.max(jnp.abs(out - ref_f(x_small)))}")

    # 2) Larger batch, feature-major API, ragged last tile, both layer-1 paths.
    x_big = jax.random.normal(kx, (640, IN_DIM), jnp.float32)
    for mxu_l1 in (False, True):
        out_fm = jax.block_until_ready(
            odefunc_forward_fm(t, x_big.T, params, layer1_on_mxu=mxu_l1))
        assert out_fm.shape == (OUT_DIM, 640)
        assert jnp.allclose(out_fm.T, ref_f(x_big), atol=1e-5, rtol=1e-5), (
            f"fwd big (mxu_l1={mxu_l1}) max err "
            f"{jnp.max(jnp.abs(out_fm.T - ref_f(x_big)))}")

    # 3) Fused RK4 solve: n_steps * 4 f() evaluations in one pallas_call.
    dt, n_steps = 0.1, 5
    got = jax.block_until_ready(
        odefunc_rk4_solve_fm(x_big.T, params, dt=dt, n_steps=n_steps))

    def rk4_ref(x):
        for _ in range(n_steps):
            s1 = ref_f(x)
            s2 = ref_f(x + 0.5 * dt * s1)
            s3 = ref_f(x + 0.5 * dt * s2)
            s4 = ref_f(x + dt * s3)
            x = x + (dt / 6.0) * (s1 + 2.0 * s2 + 2.0 * s3 + s4)
        return x

    want = rk4_ref(x_big)
    assert got.shape == (OUT_DIM, 640)
    assert jnp.allclose(got.T, want, atol=1e-4, rtol=1e-4), (
        f"rk4 max err {jnp.max(jnp.abs(got.T - want))}")

    print("KERNEL_OK")
</pallas_src>

<mosaic_0001>
module attributes {stable_mosaic.version = 11 : i64} {
  func.func @kernel(%arg0: i32, %arg1: memref<2x128xf32, #tpu.memory_space<vmem>>, %arg2: memref<50x2xf32, #tpu.memory_space<vmem>>, %arg3: memref<50x1xf32, #tpu.memory_space<vmem>>, %arg4: memref<2x50xf32, #tpu.memory_space<vmem>>, %arg5: memref<2x1xf32, #tpu.memory_space<vmem>>, %arg6: memref<2x128xf32, #tpu.memory_space<vmem>>) attributes {dimension_semantics = [#tpu.dimension_semantics<parallel>], iteration_bounds = array<i64: 1>, scalar_prefetch = 0 : i64, scratch_operands = 0 : i64, tpu.core_type = #tpu.core_type<tc>, window_params = [{transform_indices = @transform_0, window_bounds = array<i64: 2, 128>}, {pipeline_mode = #tpu.pipeline_mode<synchronous>, transform_indices = @transform_1, window_bounds = array<i64: 50, 2>}, {pipeline_mode = #tpu.pipeline_mode<synchronous>, transform_indices = @transform_2, window_bounds = array<i64: 50, 1>}, {pipeline_mode = #tpu.pipeline_mode<synchronous>, transform_indices = @transform_3, window_bounds = array<i64: 2, 50>}, {pipeline_mode = #tpu.pipeline_mode<synchronous>, transform_indices = @transform_4, window_bounds = array<i64: 2, 1>}, {transform_indices = @transform_5, window_bounds = array<i64: 2, 128>}]} {
    %c0 = arith.constant 0 : index
    %c0_0 = arith.constant 0 : index
    %0 = vector.load %arg1[%c0, %c0_0] : memref<2x128xf32, #tpu.memory_space<vmem>>, vector<2x128xf32>
    %c0_1 = arith.constant 0 : index
    %c0_2 = arith.constant 0 : index
    %1 = vector.load %arg2[%c0_1, %c0_2] : memref<50x2xf32, #tpu.memory_space<vmem>>, vector<50x2xf32>
    %c0_3 = arith.constant 0 : index
    %c0_4 = arith.constant 0 : index
    %2 = vector.load %arg3[%c0_3, %c0_4] : memref<50x1xf32, #tpu.memory_space<vmem>>, vector<50x1xf32>
    %c0_5 = arith.constant 0 : index
    %c0_6 = arith.constant 0 : index
    %3 = vector.load %arg4[%c0_5, %c0_6] : memref<2x50xf32, #tpu.memory_space<vmem>>, vector<2x50xf32>
    %c0_7 = arith.constant 0 : index
    %c0_8 = arith.constant 0 : index
    %4 = vector.load %arg5[%c0_7, %c0_8] : memref<2x1xf32, #tpu.memory_space<vmem>>, vector<2x1xf32>
    %5 = vector.extract_strided_slice %1 {offsets = [0, 0], sizes = [50, 1], strides = [1, 1]} : vector<50x2xf32> to vector<50x1xf32>
    %6 = vector.extract_strided_slice %0 {offsets = [0, 0], sizes = [1, 128], strides = [1, 1]} : vector<2x128xf32> to vector<1x128xf32>
    %7 = vector.broadcast %5 : vector<50x1xf32> to vector<50x128xf32>
    %8 = vector.broadcast %6 : vector<1x128xf32> to vector<50x128xf32>
    %9 = arith.mulf %7, %8 : vector<50x128xf32>
    %10 = vector.extract_strided_slice %1 {offsets = [0, 1], sizes = [50, 1], strides = [1, 1]} : vector<50x2xf32> to vector<50x1xf32>
    %11 = vector.extract_strided_slice %0 {offsets = [1, 0], sizes = [1, 128], strides = [1, 1]} : vector<2x128xf32> to vector<1x128xf32>
    %12 = vector.broadcast %10 : vector<50x1xf32> to vector<50x128xf32>
    %13 = vector.broadcast %11 : vector<1x128xf32> to vector<50x128xf32>
    %14 = arith.mulf %12, %13 : vector<50x128xf32>
    %15 = arith.addf %9, %14 : vector<50x128xf32>
    %16 = vector.broadcast %2 : vector<50x1xf32> to vector<50x128xf32>
    %17 = arith.addf %15, %16 : vector<50x128xf32>
    %18 = math.tanh %17 : vector<50x128xf32>
    %cst = arith.constant dense<0.000000e+00> : vector<2x128xf32>
    %19 = tpu.matmul %3, %18, %cst {dimension_numbers = #tpu.dot_dimension_numbers<[1], [0], [0], [1], [0, 0, 1, 1], [], []>} : vector<2x50xf32>, vector<50x128xf32>, vector<2x128xf32> -> vector<2x128xf32>
    %20 = vector.broadcast %4 : vector<2x1xf32> to vector<2x128xf32>
    %21 = arith.addf %19, %20 : vector<2x128xf32>
    %c0_9 = arith.constant 0 : index
    %c0_10 = arith.constant 0 : index
    %22 = vector.load %arg6[%c0_9, %c0_10] : memref<2x128xf32, #tpu.memory_space<vmem>>, vector<2x128xf32>
    tpu.vector_store %arg6[%c0_9, %c0_10], %21 {strides = array<i32>} : memref<2x128xf32, #tpu.memory_space<vmem>>, vector<2x128xf32>,
    return
  }
  func.func @transform_0(%arg0: i32) -> (i32, i32) {
    %c0_i32 = arith.constant 0 : i32
    %c0_i32_0 = arith.constant 0 : i32
    return %c0_i32, %arg0 : i32, i32
  }
  func.func @transform_1(%arg0: i32) -> (i32, i32) {
    %c0_i32 = arith.constant 0 : i32
    %c0_i32_0 = arith.constant 0 : i32
    %c0_i32_1 = arith.constant 0 : i32
    return %c0_i32, %c0_i32_0 : i32, i32
  }
  func.func @transform_2(%arg0: i32) -> (i32, i32) {
    %c0_i32 = arith.constant 0 : i32
    %c0_i32_0 = arith.constant 0 : i32
    %c0_i32_1 = arith.constant 0 : i32
    return %c0_i32, %c0_i32_0 : i32, i32
  }
  func.func @transform_3(%arg0: i32) -> (i32, i32) {
    %c0_i32 = arith.constant 0 : i32
    %c0_i32_0 = arith.constant 0 : i32
    %c0_i32_1 = arith.constant 0 : i32
    return %c0_i32, %c0_i32_0 : i32, i32
  }
  func.func @transform_4(%arg0: i32) -> (i32, i32) {
    %c0_i32 = arith.constant 0 : i32
    %c0_i32_0 = arith.constant 0 : i32
    %c0_i32_1 = arith.constant 0 : i32
    return %c0_i32, %c0_i32_0 : i32, i32
  }
  func.func @transform_5(%arg0: i32) -> (i32, i32) {
    %c0_i32 = arith.constant 0 : i32
    %c0_i32_0 = arith.constant 0 : i32
    return %c0_i32, %arg0 : i32, i32
  }
}

</mosaic_0001>

<bundles_post_ra>
// kernel: tpu_custom_call.1
= control target key start
LH: loop header
LB: loop body
LE: loop exit
PB: predicated region body
PF: predicated region fallthrough
CT: control target
= control target key end

     0   :  { %v355_v2 = vmov 0   ;;  %s452_s0 = inlined_call_operand.vmem [shape: f32[2,8], index: 0, kind: input, shape index: {}]   ;;  %s453_s1 = inlined_call_operand.vmem [shape: f32[50,2], index: 1, kind: input, shape index: {}]   ;;  %s454_s2 = inlined_call_operand.vmem [shape: f32[50,1], index: 2, kind: input, shape index: {}]   ;;  %s455_s3 = inlined_call_operand.vmem [shape: f32[2,50], index: 3, kind: input, shape index: {}]   ;;  %s456_s4 = inlined_call_operand.vmem [shape: f32[2,1], index: 4, kind: input, shape index: {}]   ;;  %s457_s5 = inlined_call_operand.hbm [shape: f32[2,8], index: 5, kind: output, shape index: {}]  }
   0x1   :  { %v28_v0 = vld [vmem:[%s453_s1 + $0x30] sm:$0x3]  ;;  %v27_v1 = vld [vmem:[%s453_s1 + $0x28] sm:$0xff]  ;;  %310 = vset.pattern.permute.xlu1 %v355_v2  ;;  %309 = vset.pattern.permute.xlu0 %v355_v2  ;;  %v25_v3 = vld [vmem:[%s453_s1 + $0x18] sm:$0xff] }
   0x2   :  { %70 = vperm.xlu0 %309, %v28_v0   ;;  %65 = vperm.xlu1 %310, %v27_v1  }
   0x3   :  { %10 = vsyncpa [#allocation3], 0  ;;  %v356_v4 = vmov 1   ;;  %v24_v5 = vld [vmem:[%s453_s1 + $0x10] sm:$0xff]  ;;  %v26_v6 = vld [vmem:[%s453_s1 + $0x20] sm:$0xff]  ;;  %v357_v13 = vmov 0.0   ;;  %v73_v20 = vlaneseq }
   0x4   :  { %v33_v7 = vld [vmem:[%s454_s2 + $0x20] sm:$0xff]  ;;  %v35_v8 = vld [vmem:[%s454_s2 + $0x30] sm:$0x3]  ;;  %v34_v9 = vld [vmem:[%s454_s2 + $0x28] sm:$0xff]  ;;  %287 = vmatprep.subr.mxu0 %v357_v13  ;;  %vm358_vm0 = vmmov 0   ;;  %vm188_vm1 = vcmask 1041408  }
   0x5   :  { %v23_v10 = vld [vmem:[%s453_s1 + $0x8] sm:$0xff]  ;;  %v22_v11 = vld [vmem:[%s453_s1] sm:$0xff]  ;;  %v32_v14 = vld [vmem:[%s454_s2 + $0x18] sm:$0xff]  ;;  %301 = vmatprep.mubr.msk.f32.mxu0 %vm358_vm0, %v357_v13  ;;  %v74_v23 = vshrl.u32 %v73_v20, 7  ;;  %vm184_vm2 = vcmask 408576   ;;  %s359_s23 = smov [#allocation2]  }
   0x6   :  { %311 = vset.pattern.permute.xlu1 %v356_v4  ;;  %55 = vperm.xlu0 %309, %v25_v3   ;;  %v30_v12 = vld [vmem:[%s454_s2 + $0x8] sm:$0xff]  ;;  %v31_v15 = vld [vmem:[%s454_s2 + $0x10] sm:$0xff]  ;;  %v29_v16 = vld [vmem:[%s454_s2] sm:$0xff]  ;;  %s269_s24 = sshll.u32 %s359_s23, 4  ;;  %s270_s24 = int_to_ptr.vmem [resolvable:$true] %s269_s24 }
   0x7   :  { %105 = vperm.xlu1 %311, %v27_v1   ;;  %v37_v17 = vld [vmem:[%s456_s4] sm:$0x3]  ;;  %v114_v26 = vsub.s32 1, %v74_v23  ;;  %v75_v27 = vsub.s32 0, %v74_v23  ;;  %s333_s25 = scalar_lea.vmem %s270_s24, 32  ;;  %p338_p1 = scmp.lt.s32.totalorder %s270_s24, %s270_s24 }
   0x8   :  { %v21_v29 = vld [vmem:[%s452_s0] sm:$0x3]  ;;  %p334_p0 = scmp.ne.s32.totalorder %s270_s24, %s333_s25  ;;  %p339_p2 = scmp.lt.s32.totalorder %s333_s25, %s333_s25 }
   0x9   :  { %v115_v31 = vrot.slane %v21_v29, %v114_v26  ;;  %v76_v32 = vrot.slane %v21_v29, %v75_v27 }
   0xa   :  { %50 = vperm.xlu0 %309, %v24_v5   ;;  %p340_p3 = por %p339_p2, %p338_p1 }
   0xb   :  { %312 = vset.pattern.permute.xlu1 %v355_v2 }
   0xc   :  { %60 = vperm.xlu1 %312, %v26_v6   ;;  %p341_p4 = pnand %p340_p3, %p334_p0 }
   0xe   :  { %152 = vperm.xlu0 %309, %v33_v7  }
  0x10   :  { %162 = vperm.xlu1 %312, %v35_v8  }
  0x12   :  { %316 = vset.pattern.permute.xlu0 %v356_v4 }
  0x13   :  { %109 = vperm.xlu0 %316, %v28_v0  }
  0x14   :  { %313 = vset.pattern.permute.xlu1 %v356_v4 }
  0x15   :  { %97 = vperm.xlu1 %313, %v25_v3  }
  0x17   :  { %101 = vperm.xlu0 %316, %v26_v6  }
  0x19   :  { %314 = vset.pattern.permute.xlu1 %v355_v2 }
  0x1a   :  { %157 = vperm.xlu1 %314, %v34_v9  }
  0x1b   :  { %89 = vperm.xlu0 %316, %v23_v10  }
  0x1e   :  { %315 = vset.pattern.permute.xlu1 %v356_v4 }
  0x1f   :  { %93 = vperm.xlu1 %315, %v24_v5   ;;  %85 = vperm.xlu0 %316, %v22_v11  }
  0x23   :  { %317 = vset.pattern.permute.xlu1 %v355_v2  ;;  %318 = vset.pattern.permute.xlu0 %v355_v2 }
  0x24   :  { %45 = vperm.xlu1 %317, %v23_v10   ;;  %137 = vperm.xlu0 %318, %v30_v12  }
  0x28   :  { %147 = vperm.xlu1 %317, %v32_v14  }
  0x2c   :  { %40 = vperm.xlu1 %317, %v22_v11  }
  0x30   :  { %142 = vperm.xlu1 %317, %v31_v15  }
  0x34   :  { %132 = vperm.xlu1 %317, %v29_v16  }
  0x38   :  { %181 = vperm.xlu1 %317, %v37_v17   ;;  %v36_v17 = vld [vmem:[%s455_s3] sm:$0x3] }
  0x7d   :  { %v66_v18 = vpop.permute.xlu1 %65  ;;  %v71_v19 = vpop.permute.xlu0 %70 }
  0x7e   :  { %v83_v34 = vmul.f32 %v76_v32, %v71_v19  ;;  %v82_v39 = vmul.f32 %v76_v32, %v66_v18 }
  0x81   :  { %v56_v21 = vpop.permute.xlu0 %55 }
  0x82   :  { %v106_v22 = vpop.permute.xlu1 %105  ;;  %v80_v53 = vmul.f32 %v76_v32, %v56_v21 }
  0x83   :  { %v121_v36 = vmul.f32 %v115_v31, %v106_v22 }
  0x85   :  { %v51_v24 = vpop.permute.xlu0 %50  ;;  %v128_v44 = vadd.f32 %v121_v36, %v82_v39 }
  0x86   :  { %v79_v1 = vmul.f32 %v76_v32, %v51_v24 }
  0x87   :  { %v61_v25 = vpop.permute.xlu1 %60 }
  0x88   :  { %v81_v41 = vmul.f32 %v76_v32, %v61_v25 }
  0x89   :  { %v153_v28 = vpop.permute.xlu0 %152 }
  0x8b   :  { %v163_v30 = vpop.permute.xlu1 %162 }
  0x8e   :  { %v110_v33 = vpop.permute.xlu0 %109 }
  0x8f   :  { %v122_v35 = vmul.f32 %v115_v31, %v110_v33 }
  0x90   :  { %v98_v37 = vpop.permute.xlu1 %97 }
  0x91   :  { %v129_v38 = vadd.f32 %v122_v35, %v83_v34  ;;  %v119_v50 = vmul.f32 %v115_v31, %v98_v37 }
  0x92   :  { %v102_v40 = vpop.permute.xlu0 %101 }
  0x93   :  { %v171_v42 = vadd.f32 %v163_v30, %v129_v38  ;;  %v120_v43 = vmul.f32 %v115_v31, %v102_v40  ;;  %v126_v55 = vadd.f32 %v119_v50, %v80_v53 }
  0x95   :  { %319 = vtanh.f32 %v171_v42  ;;  %v127_v45 = vadd.f32 %v120_v43, %v81_v41  ;;  %v158_v46 = vpop.permute.xlu1 %157 }
  0x96   :  { %v170_v47 = vadd.f32 %v158_v46, %v128_v44  ;;  %v90_v51 = vpop.permute.xlu0 %89 }
  0x97   :  { %v169_v48 = vadd.f32 %v153_v28, %v127_v45  ;;  %v117_v62 = vmul.f32 %v115_v31, %v90_v51 }
  0x98   :  { %321 = vtanh.f32 %v170_v47 }
  0x99   :  { %323 = vtanh.f32 %v169_v48 }
  0x9a   :  { %v94_v49 = vpop.permute.xlu1 %93  ;;  %v86_v60 = vpop.permute.xlu0 %85 }
  0x9b   :  { %v118_v63 = vmul.f32 %v115_v31, %v94_v49  ;;  %v116_v7 = vmul.f32 %v115_v31, %v86_v60 }
  0x9d   :  { %v125_v5 = vadd.f32 %v118_v63, %v79_v1 }
  0x9f   :  { %v46_v52 = vpop.permute.xlu1 %45  ;;  %v138_v3 = vpop.permute.xlu0 %137 }
  0xa0   :  { %v78_v57 = vmul.f32 %v76_v32, %v46_v52 }
  0xa2   :  { %v320_v54 = vpop.eup %319  ;;  %v124_v2 = vadd.f32 %v117_v62, %v78_v57 }
  0xa3   :  { %v148_v56 = vpop.permute.xlu1 %147  ;;  %288 = vmatpush3.msk.msra.mxu0 %vm188_vm1, %v320_v54 }
  0xa4   :  { %v168_v58 = vadd.f32 %v148_v56, %v126_v55  ;;  %289 = vmatprep.subr.mxu0 %v357_v13  ;;  %v166_v8 = vadd.f32 %v138_v3, %v124_v2 }
  0xa5   :  { %v322_v59 = vpop.eup %321 }
  0xa6   :  { %v324_v61 = vpop.eup %323  ;;  %325 = vtanh.f32 %v168_v58  ;;  %290 = vmatpush3.msra.mxu0 %v322_v59 }
  0xa7   :  { %v41_v0 = vpop.permute.xlu1 %40  ;;  %291 = vmatprep.subr.mxu0 %v357_v13 }
  0xa8   :  { %292 = vmatpush3.msra.mxu0 %v324_v61  ;;  %v77_v4 = vmul.f32 %v76_v32, %v41_v0 }
  0xa9   :  { %293 = vmatprep.subr.mxu0 %v357_v13 }
  0xaa   :  { %v123_v10 = vadd.f32 %v116_v7, %v77_v4 }
  0xab   :  { %v143_v6 = vpop.permute.xlu1 %142 }
  0xac   :  { %v167_v9 = vadd.f32 %v143_v6, %v125_v5 }
  0xae   :  { %327 = vtanh.f32 %v167_v9 }
  0xaf   :  { %v133_v11 = vpop.permute.xlu1 %132  ;;  %329 = vtanh.f32 %v166_v8 }
  0xb0   :  { %v165_v12 = vadd.f32 %v133_v11, %v123_v10 }
  0xb2   :  { %331 = vtanh.f32 %v165_v12 }
  0xb3   :  { %v326_v14 = vpop.eup %325  ;;  %v182_v19 = vpop.permute.xlu1 %181 }
  0xb4   :  { %294 = vmatpush3.msra.mxu0 %v326_v14 }
  0xb5   :  { %295 = vmatprep.subr.mxu0 %v357_v13 }
  0xbb   :  { %v328_v15 = vpop.eup %327 }
  0xbc   :  { %296 = vmatpush3.msra.mxu0 %v328_v15  ;;  %v330_v16 = vpop.eup %329 }
  0xbd   :  { %297 = vmatprep.subr.mxu0 %v357_v13 }
  0xbe   :  { %298 = vmatpush3.msra.mxu0 %v330_v16 }
  0xbf   :  { %v332_v18 = vpop.eup %331  ;;  %299 = vmatprep.subr.mxu0 %v357_v13 }
  0xc0   :  { %300 = vmatpush3.msra.mxu0 %v332_v18 }
  0xc1   :  { %302 = vmatmul.mubr.msk.f32.vlgmr.msra.gmra.mxu0 %vm184_vm2, %v36_v17 }
 0x181   :  { %v258_v20 = vpop.f32.mrf.mxu0 }
 0x182   :  { %v259_v21 = vadd.f32 %v258_v20, %v182_v19 }
 0x183   :  { %v303_v22 = vpop.f32.mrf.mxu0 }
 0x184   :  { %262 = vst [vmem:[#allocation2] sm:$0x3] %v259_v21 }
 0x185   :  { %344 = shalt.err (!%p341_p4)
}
 0x186   :  { %272 = dma.vmem_to_hbm [thread:$0]  %s270_s24, 32, %s457_s5, [#allocation3]  }
 0x187   :  { %353 = dma.done.wait [#allocation3], 32  }
 0x188   :  { %354 = vsyncadd [#allocation3], 4294967264 }
 0x189   :  { %276 = vsyncpa [#allocation3], 1 }

</bundles_post_ra>
